<compile_context>
chip_gen: v5e
topology: v5e:2x2
jax: 0.10.0
libtpu: 0.0.40
codegen_flags: <defaults>
</compile_context>

<pallas_src>
import functools

import jax
import jax.numpy as jnp
from jax import lax
from jax.experimental import pallas as pl
from jax.experimental.pallas import tpu as pltpu

LANE = 128  # TPU lane width; all feature/hidden/output dims padded to this.


# ----------------------------- fused kernel -------------------------------- #

def _graphormer_kernel(src_ref, dst_ref, batch_ref,          # int32 index rows
                       x_ref, ea_ref,                        # padded raw feats
                       wn_ref, bn_ref, we_ref, be_ref,       # encoder
                       wm_ref, bm_ref, wu_ref, bu_ref,       # processor
                       w1_ref, b1_ref, w2_ref, b2_ref,       # decoder
                       o_ref, *, n_nodes, n_edges, n_graphs):
    f32 = jnp.float32

    # ---------------- encoder ----------------
    h = jnp.dot(x_ref[...], wn_ref[...], preferred_element_type=f32) + bn_ref[...]
    h = jnp.maximum(h, 0.0)                                                   # (N, HP)
    he = jnp.dot(ea_ref[...], we_ref[...], preferred_element_type=f32) + be_ref[...]
    he = jnp.maximum(he, 0.0)                                                 # (E, HP)

    # ---------------- processor (one message-passing layer) ----------------
    # gather h[src]: mask[e, n] = (src[e] == n), built in-kernel (no one-hot in HBM)
    src = src_ref[...]                                                        # (E, 1) int32
    n_iota = lax.broadcasted_iota(jnp.int32, (n_edges, n_nodes), 1)
    gather_m = jnp.where(n_iota == src, 1.0, 0.0).astype(f32)                 # (E, N)
    h_src = jnp.dot(gather_m, h, preferred_element_type=f32)                  # (E, HP)

    msg = jnp.dot(h_src + he, wm_ref[...], preferred_element_type=f32) + bm_ref[...]
    msg = jnp.maximum(msg, 0.0)                                               # (E, HP)

    # scatter-add by dst: mask built directly in (N, E) orientation -> no transpose
    dst = dst_ref[...]                                                        # (1, E) int32
    node_iota = lax.broadcasted_iota(jnp.int32, (n_nodes, n_edges), 0)
    scatter_m = jnp.where(node_iota == dst, 1.0, 0.0).astype(f32)             # (N, E)
    agg = jnp.dot(scatter_m, msg, preferred_element_type=f32)                 # (N, HP)

    h = jnp.dot(h + agg, wu_ref[...], preferred_element_type=f32) + bu_ref[...]
    h = jnp.maximum(h, 0.0)                                                   # (N, HP)

    # ---------------- global mean pool ----------------
    b_ids = batch_ref[...]                                                    # (1, N) int32
    g_iota = lax.broadcasted_iota(jnp.int32, (n_graphs, n_nodes), 0)
    seg = jnp.where(g_iota == b_ids, 1.0, 0.0).astype(f32)                    # (B, N)
    counts = jnp.maximum(jnp.sum(seg, axis=1, keepdims=True), 1.0)            # (B, 1)
    pooled = jnp.dot(seg, h, preferred_element_type=f32) / counts             # (B, HP)

    # ---------------- decoder ----------------
    hid = jnp.dot(pooled, w1_ref[...], preferred_element_type=f32) + b1_ref[...]
    hid = jnp.maximum(hid, 0.0)
    out = jnp.dot(hid, w2_ref[...], preferred_element_type=f32) + b2_ref[...]
    o_ref[...] = out.astype(o_ref.dtype)                                      # (B, OUT_P) lane-dense


# ------------------------------ wrapper ------------------------------------ #

def _full_spec(shape):
    return pl.BlockSpec(shape, lambda i, _s=len(shape): (0,) * _s)


def _pad_to(arr, rows=None, cols=None):
    r, c = arr.shape
    pr = 0 if rows is None else rows - r
    pc = 0 if cols is None else cols - c
    return jnp.pad(arr, ((0, pr), (0, pc)))


def graphormer_forward(params, x, edge_index, edge_attr, batch, num_graphs):
    n = x.shape[0]
    e = edge_attr.shape[0]
    out_dim = params["W2"].shape[1]

    hp = LANE        # padded hidden width
    fp = LANE        # padded raw-feature (matmul K) width
    outp = LANE      # padded decoder output width (lane-dense store, slice outside)

    # zero-padding is value-preserving (padded rows/cols of weights are zero)
    x_p = _pad_to(x.astype(jnp.float32), cols=fp)
    ea_p = _pad_to(edge_attr.astype(jnp.float32), cols=fp)

    wn = _pad_to(params["Wn"], rows=fp, cols=hp); bn = _pad_to(params["bn"], cols=hp)
    we = _pad_to(params["We"], rows=fp, cols=hp); be = _pad_to(params["be"], cols=hp)
    wm = _pad_to(params["Wm"], rows=hp, cols=hp); bm = _pad_to(params["bm"], cols=hp)
    wu = _pad_to(params["Wu"], rows=hp, cols=hp); bu = _pad_to(params["bu"], cols=hp)
    w1 = _pad_to(params["W1"], rows=hp, cols=hp); b1 = _pad_to(params["b1"], cols=hp)
    w2 = _pad_to(params["W2"], rows=hp, cols=outp); b2 = _pad_to(params["b2"], cols=outp)

    # compact int32 index rows (instead of dense E x N / B x N one-hot matrices)
    src = edge_index[0].astype(jnp.int32).reshape(e, 1)
    dst = edge_index[1].astype(jnp.int32).reshape(1, e)
    bat = batch.astype(jnp.int32).reshape(1, n)

    kernel = functools.partial(_graphormer_kernel,
                               n_nodes=n, n_edges=e, n_graphs=num_graphs)

    out_p = pl.pallas_call(
        kernel,
        out_shape=jax.ShapeDtypeStruct((num_graphs, outp), jnp.float32),
        grid=(1,),
        in_specs=[
            _full_spec((e, 1)), _full_spec((1, e)), _full_spec((1, n)),
            _full_spec((n, fp)), _full_spec((e, fp)),
            _full_spec((fp, hp)), _full_spec((1, hp)),
            _full_spec((fp, hp)), _full_spec((1, hp)),
            _full_spec((hp, hp)), _full_spec((1, hp)),
            _full_spec((hp, hp)), _full_spec((1, hp)),
            _full_spec((hp, hp)), _full_spec((1, hp)),
            _full_spec((hp, outp)), _full_spec((1, outp)),
        ],
        out_specs=_full_spec((num_graphs, outp)),
        compiler_params=pltpu.CompilerParams(dimension_semantics=("arbitrary",)),
    )(src, dst, bat, x_p, ea_p, wn, bn, we, be, wm, bm, wu, bu, w1, b1, w2, b2)

    return out_p[:, :out_dim]


# pure-JAX reference for a sanity check
def reference_forward(params, x, edge_index, edge_attr, batch, num_graphs):
    relu = lambda v: jnp.maximum(v, 0.0)
    h_node = relu(x @ params["Wn"] + params["bn"])
    h_edge = relu(edge_attr @ params["We"] + params["be"])
    msg = relu((h_node[edge_index[0]] + h_edge) @ params["Wm"] + params["bm"])
    agg = jnp.zeros_like(h_node).at[edge_index[1]].add(msg)
    h_node = relu((h_node + agg) @ params["Wu"] + params["bu"])
    pooled = jax.ops.segment_sum(h_node, batch, num_segments=num_graphs)
    counts = jax.ops.segment_sum(jnp.ones((x.shape[0], 1)), batch, num_segments=num_graphs)
    pooled = pooled / jnp.maximum(counts, 1.0)
    hid = relu(pooled @ params["W1"] + params["b1"])
    return hid @ params["W2"] + params["b2"]


# ------------------------------ main --------------------------------------- #

if __name__ == "__main__":
    N, E, B = 16, 32, 2          # nodes, edges, graphs
    F_NODE, F_EDGE = 8, 4        # raw feature dims
    H, OUT = 32, 1               # hidden dim, decoder output dim

    key = jax.random.PRNGKey(0)
    ks = jax.random.split(key, 12)

    def init_w(k, fan_in, fan_out):
        return (jax.random.normal(k, (fan_in, fan_out), jnp.float32)
                / jnp.sqrt(jnp.float32(fan_in)))

    params = {
        "Wn": init_w(ks[0], F_NODE, H), "bn": jnp.zeros((1, H), jnp.float32),
        "We": init_w(ks[1], F_EDGE, H), "be": jnp.zeros((1, H), jnp.float32),
        "Wm": init_w(ks[2], H, H),      "bm": 0.01 * jnp.ones((1, H), jnp.float32),
        "Wu": init_w(ks[3], H, H),      "bu": 0.01 * jnp.ones((1, H), jnp.float32),
        "W1": init_w(ks[4], H, H),      "b1": jnp.zeros((1, H), jnp.float32),
        "W2": init_w(ks[5], H, OUT),    "b2": jnp.zeros((1, OUT), jnp.float32),
    }

    # deterministic small graph: nodes 0..7 -> graph 0, nodes 8..15 -> graph 1
    x = jax.random.normal(ks[6], (N, F_NODE), jnp.float32)
    edge_attr = jax.random.normal(ks[7], (E, F_EDGE), jnp.float32)
    e_ids = jnp.arange(E)
    g = e_ids % 2
    src = g * 8 + ((e_ids // 2) % 8)
    dst = g * 8 + (((e_ids // 2) * 3 + 1) % 8)
    edge_index = jnp.stack([src, dst]).astype(jnp.int32)      # (2, E)
    batch = (jnp.arange(N) // 8).astype(jnp.int32)             # (N,)

    out = graphormer_forward(params, x, edge_index, edge_attr, batch, B)
    out = jax.block_until_ready(out)

    ref = reference_forward(params, x, edge_index, edge_attr, batch, B)
    assert out.shape == (B, OUT)
    assert jnp.allclose(out, ref, atol=1e-4, rtol=1e-4), (out, ref)

    print("KERNEL_OK")
</pallas_src>

<mosaic_0001>
module attributes {stable_mosaic.version = 11 : i64} {
  func.func @_graphormer_kernel(%arg0: i32, %arg1: memref<32x1xi32, #tpu.memory_space<vmem>>, %arg2: memref<1x32xi32, #tpu.memory_space<vmem>>, %arg3: memref<1x16xi32, #tpu.memory_space<vmem>>, %arg4: memref<16x128xf32, #tpu.memory_space<vmem>>, %arg5: memref<32x128xf32, #tpu.memory_space<vmem>>, %arg6: memref<128x128xf32, #tpu.memory_space<vmem>>, %arg7: memref<1x128xf32, #tpu.memory_space<vmem>>, %arg8: memref<128x128xf32, #tpu.memory_space<vmem>>, %arg9: memref<1x128xf32, #tpu.memory_space<vmem>>, %arg10: memref<128x128xf32, #tpu.memory_space<vmem>>, %arg11: memref<1x128xf32, #tpu.memory_space<vmem>>, %arg12: memref<128x128xf32, #tpu.memory_space<vmem>>, %arg13: memref<1x128xf32, #tpu.memory_space<vmem>>, %arg14: memref<128x128xf32, #tpu.memory_space<vmem>>, %arg15: memref<1x128xf32, #tpu.memory_space<vmem>>, %arg16: memref<128x128xf32, #tpu.memory_space<vmem>>, %arg17: memref<1x128xf32, #tpu.memory_space<vmem>>, %arg18: memref<2x128xf32, #tpu.memory_space<vmem>>) attributes {dimension_semantics = [#tpu.dimension_semantics<arbitrary>], iteration_bounds = array<i64: 1>, scalar_prefetch = 0 : i64, scratch_operands = 0 : i64, tpu.core_type = #tpu.core_type<tc>, window_params = [{pipeline_mode = #tpu.pipeline_mode<synchronous>, transform_indices = @transform_0, window_bounds = array<i64: 32, 1>}, {pipeline_mode = #tpu.pipeline_mode<synchronous>, transform_indices = @transform_1, window_bounds = array<i64: 1, 32>}, {pipeline_mode = #tpu.pipeline_mode<synchronous>, transform_indices = @transform_2, window_bounds = array<i64: 1, 16>}, {pipeline_mode = #tpu.pipeline_mode<synchronous>, transform_indices = @transform_3, window_bounds = array<i64: 16, 128>}, {pipeline_mode = #tpu.pipeline_mode<synchronous>, transform_indices = @transform_4, window_bounds = array<i64: 32, 128>}, {pipeline_mode = #tpu.pipeline_mode<synchronous>, transform_indices = @transform_5, window_bounds = array<i64: 128, 128>}, {pipeline_mode = #tpu.pipeline_mode<synchronous>, transform_indices = @transform_6, window_bounds = array<i64: 1, 128>}, {pipeline_mode = #tpu.pipeline_mode<synchronous>, transform_indices = @transform_7, window_bounds = array<i64: 128, 128>}, {pipeline_mode = #tpu.pipeline_mode<synchronous>, transform_indices = @transform_8, window_bounds = array<i64: 1, 128>}, {pipeline_mode = #tpu.pipeline_mode<synchronous>, transform_indices = @transform_9, window_bounds = array<i64: 128, 128>}, {pipeline_mode = #tpu.pipeline_mode<synchronous>, transform_indices = @transform_10, window_bounds = array<i64: 1, 128>}, {pipeline_mode = #tpu.pipeline_mode<synchronous>, transform_indices = @transform_11, window_bounds = array<i64: 128, 128>}, {pipeline_mode = #tpu.pipeline_mode<synchronous>, transform_indices = @transform_12, window_bounds = array<i64: 1, 128>}, {pipeline_mode = #tpu.pipeline_mode<synchronous>, transform_indices = @transform_13, window_bounds = array<i64: 128, 128>}, {pipeline_mode = #tpu.pipeline_mode<synchronous>, transform_indices = @transform_14, window_bounds = array<i64: 1, 128>}, {pipeline_mode = #tpu.pipeline_mode<synchronous>, transform_indices = @transform_15, window_bounds = array<i64: 128, 128>}, {pipeline_mode = #tpu.pipeline_mode<synchronous>, transform_indices = @transform_16, window_bounds = array<i64: 1, 128>}, {pipeline_mode = #tpu.pipeline_mode<synchronous>, transform_indices = @transform_17, window_bounds = array<i64: 2, 128>}]} {
    %c0 = arith.constant 0 : index
    %c0_0 = arith.constant 0 : index
    %0 = vector.load %arg4[%c0, %c0_0] : memref<16x128xf32, #tpu.memory_space<vmem>>, vector<16x128xf32>
    %c0_1 = arith.constant 0 : index
    %c0_2 = arith.constant 0 : index
    %1 = vector.load %arg6[%c0_1, %c0_2] : memref<128x128xf32, #tpu.memory_space<vmem>>, vector<128x128xf32>
    %cst = arith.constant dense<0.000000e+00> : vector<16x128xf32>
    %2 = tpu.matmul %0, %1, %cst {dimension_numbers = #tpu.dot_dimension_numbers<[1], [0], [0], [1], [0, 0, 1, 1], [], []>} : vector<16x128xf32>, vector<128x128xf32>, vector<16x128xf32> -> vector<16x128xf32>
    %c0_3 = arith.constant 0 : index
    %c0_4 = arith.constant 0 : index
    %3 = vector.load %arg7[%c0_3, %c0_4] : memref<1x128xf32, #tpu.memory_space<vmem>>, vector<1x128xf32>
    %4 = vector.broadcast %3 : vector<1x128xf32> to vector<16x128xf32>
    %5 = arith.addf %2, %4 : vector<16x128xf32>
    %cst_5 = arith.constant 0.000000e+00 : f32
    %6 = vector.broadcast %cst_5 : f32 to vector<16x128xf32>
    %7 = arith.maximumf %5, %6 : vector<16x128xf32>
    %c0_6 = arith.constant 0 : index
    %c0_7 = arith.constant 0 : index
    %8 = vector.load %arg5[%c0_6, %c0_7] : memref<32x128xf32, #tpu.memory_space<vmem>>, vector<32x128xf32>
    %c0_8 = arith.constant 0 : index
    %c0_9 = arith.constant 0 : index
    %9 = vector.load %arg8[%c0_8, %c0_9] : memref<128x128xf32, #tpu.memory_space<vmem>>, vector<128x128xf32>
    %cst_10 = arith.constant dense<0.000000e+00> : vector<32x128xf32>
    %10 = tpu.matmul %8, %9, %cst_10 {dimension_numbers = #tpu.dot_dimension_numbers<[1], [0], [0], [1], [0, 0, 1, 1], [], []>} : vector<32x128xf32>, vector<128x128xf32>, vector<32x128xf32> -> vector<32x128xf32>
    %c0_11 = arith.constant 0 : index
    %c0_12 = arith.constant 0 : index
    %11 = vector.load %arg9[%c0_11, %c0_12] : memref<1x128xf32, #tpu.memory_space<vmem>>, vector<1x128xf32>
    %12 = vector.broadcast %11 : vector<1x128xf32> to vector<32x128xf32>
    %13 = arith.addf %10, %12 : vector<32x128xf32>
    %cst_13 = arith.constant 0.000000e+00 : f32
    %14 = vector.broadcast %cst_13 : f32 to vector<32x128xf32>
    %15 = arith.maximumf %13, %14 : vector<32x128xf32>
    %c0_14 = arith.constant 0 : index
    %c0_15 = arith.constant 0 : index
    %16 = vector.load %arg1[%c0_14, %c0_15] : memref<32x1xi32, #tpu.memory_space<vmem>>, vector<32x1xi32>
    %17 = tpu.iota {dimensions = array<i32: 1>} : vector<32x16xi32>
    %18 = vector.broadcast %16 : vector<32x1xi32> to vector<32x16xi32>
    %19 = arith.cmpi eq, %17, %18 : vector<32x16xi32>
    %cst_16 = arith.constant 1.000000e+00 : f32
    %cst_17 = arith.constant 0.000000e+00 : f32
    %20 = vector.broadcast %cst_16 : f32 to vector<32x16xf32>
    %21 = vector.broadcast %cst_17 : f32 to vector<32x16xf32>
    %22 = arith.select %19, %20, %21 : vector<32x16xi1>, vector<32x16xf32>
    %cst_18 = arith.constant dense<0.000000e+00> : vector<32x128xf32>
    %23 = tpu.matmul %22, %7, %cst_18 {dimension_numbers = #tpu.dot_dimension_numbers<[1], [0], [0], [1], [0, 0, 1, 1], [], []>} : vector<32x16xf32>, vector<16x128xf32>, vector<32x128xf32> -> vector<32x128xf32>
    %24 = arith.addf %23, %15 : vector<32x128xf32>
    %c0_19 = arith.constant 0 : index
    %c0_20 = arith.constant 0 : index
    %25 = vector.load %arg10[%c0_19, %c0_20] : memref<128x128xf32, #tpu.memory_space<vmem>>, vector<128x128xf32>
    %cst_21 = arith.constant dense<0.000000e+00> : vector<32x128xf32>
    %26 = tpu.matmul %24, %25, %cst_21 {dimension_numbers = #tpu.dot_dimension_numbers<[1], [0], [0], [1], [0, 0, 1, 1], [], []>} : vector<32x128xf32>, vector<128x128xf32>, vector<32x128xf32> -> vector<32x128xf32>
    %c0_22 = arith.constant 0 : index
    %c0_23 = arith.constant 0 : index
    %27 = vector.load %arg11[%c0_22, %c0_23] : memref<1x128xf32, #tpu.memory_space<vmem>>, vector<1x128xf32>
    %28 = vector.broadcast %27 : vector<1x128xf32> to vector<32x128xf32>
    %29 = arith.addf %26, %28 : vector<32x128xf32>
    %cst_24 = arith.constant 0.000000e+00 : f32
    %30 = vector.broadcast %cst_24 : f32 to vector<32x128xf32>
    %31 = arith.maximumf %29, %30 : vector<32x128xf32>
    %c0_25 = arith.constant 0 : index
    %c0_26 = arith.constant 0 : index
    %32 = vector.load %arg2[%c0_25, %c0_26] : memref<1x32xi32, #tpu.memory_space<vmem>>, vector<1x32xi32>
    %33 = tpu.iota {dimensions = array<i32: 0>} : vector<16x32xi32>
    %34 = vector.broadcast %32 : vector<1x32xi32> to vector<16x32xi32>
    %35 = arith.cmpi eq, %33, %34 : vector<16x32xi32>
    %cst_27 = arith.constant 1.000000e+00 : f32
    %cst_28 = arith.constant 0.000000e+00 : f32
    %36 = vector.broadcast %cst_27 : f32 to vector<16x32xf32>
    %37 = vector.broadcast %cst_28 : f32 to vector<16x32xf32>
    %38 = arith.select %35, %36, %37 : vector<16x32xi1>, vector<16x32xf32>
    %cst_29 = arith.constant dense<0.000000e+00> : vector<16x128xf32>
    %39 = tpu.matmul %38, %31, %cst_29 {dimension_numbers = #tpu.dot_dimension_numbers<[1], [0], [0], [1], [0, 0, 1, 1], [], []>} : vector<16x32xf32>, vector<32x128xf32>, vector<16x128xf32> -> vector<16x128xf32>
    %40 = arith.addf %7, %39 : vector<16x128xf32>
    %c0_30 = arith.constant 0 : index
    %c0_31 = arith.constant 0 : index
    %41 = vector.load %arg12[%c0_30, %c0_31] : memref<128x128xf32, #tpu.memory_space<vmem>>, vector<128x128xf32>
    %cst_32 = arith.constant dense<0.000000e+00> : vector<16x128xf32>
    %42 = tpu.matmul %40, %41, %cst_32 {dimension_numbers = #tpu.dot_dimension_numbers<[1], [0], [0], [1], [0, 0, 1, 1], [], []>} : vector<16x128xf32>, vector<128x128xf32>, vector<16x128xf32> -> vector<16x128xf32>
    %c0_33 = arith.constant 0 : index
    %c0_34 = arith.constant 0 : index
    %43 = vector.load %arg13[%c0_33, %c0_34] : memref<1x128xf32, #tpu.memory_space<vmem>>, vector<1x128xf32>
    %44 = vector.broadcast %43 : vector<1x128xf32> to vector<16x128xf32>
    %45 = arith.addf %42, %44 : vector<16x128xf32>
    %cst_35 = arith.constant 0.000000e+00 : f32
    %46 = vector.broadcast %cst_35 : f32 to vector<16x128xf32>
    %47 = arith.maximumf %45, %46 : vector<16x128xf32>
    %c0_36 = arith.constant 0 : index
    %c0_37 = arith.constant 0 : index
    %48 = vector.load %arg3[%c0_36, %c0_37] : memref<1x16xi32, #tpu.memory_space<vmem>>, vector<1x16xi32>
    %49 = tpu.iota {dimensions = array<i32: 0>} : vector<2x16xi32>
    %50 = vector.broadcast %48 : vector<1x16xi32> to vector<2x16xi32>
    %51 = arith.cmpi eq, %49, %50 : vector<2x16xi32>
    %cst_38 = arith.constant 1.000000e+00 : f32
    %cst_39 = arith.constant 0.000000e+00 : f32
    %52 = vector.broadcast %cst_38 : f32 to vector<2x16xf32>
    %53 = vector.broadcast %cst_39 : f32 to vector<2x16xf32>
    %54 = arith.select %51, %52, %53 : vector<2x16xi1>, vector<2x16xf32>
    %cst_40 = arith.constant dense<0.000000e+00> : vector<2xf32>
    %55 = vector.multi_reduction <add>, %54, %cst_40 [1] : vector<2x16xf32> to vector<2xf32>
    %56 = vector.shape_cast %55 : vector<2xf32> to vector<2x1xf32>
    %cst_41 = arith.constant 1.000000e+00 : f32
    %57 = vector.broadcast %cst_41 : f32 to vector<2x1xf32>
    %58 = arith.maximumf %56, %57 : vector<2x1xf32>
    %cst_42 = arith.constant dense<0.000000e+00> : vector<2x128xf32>
    %59 = tpu.matmul %54, %47, %cst_42 {dimension_numbers = #tpu.dot_dimension_numbers<[1], [0], [0], [1], [0, 0, 1, 1], [], []>} : vector<2x16xf32>, vector<16x128xf32>, vector<2x128xf32> -> vector<2x128xf32>
    %60 = vector.broadcast %58 : vector<2x1xf32> to vector<2x128xf32>
    %61 = arith.divf %59, %60 : vector<2x128xf32>
    %c0_43 = arith.constant 0 : index
    %c0_44 = arith.constant 0 : index
    %62 = vector.load %arg14[%c0_43, %c0_44] : memref<128x128xf32, #tpu.memory_space<vmem>>, vector<128x128xf32>
    %cst_45 = arith.constant dense<0.000000e+00> : vector<2x128xf32>
    %63 = tpu.matmul %61, %62, %cst_45 {dimension_numbers = #tpu.dot_dimension_numbers<[1], [0], [0], [1], [0, 0, 1, 1], [], []>} : vector<2x128xf32>, vector<128x128xf32>, vector<2x128xf32> -> vector<2x128xf32>
    %c0_46 = arith.constant 0 : index
    %c0_47 = arith.constant 0 : index
    %64 = vector.load %arg15[%c0_46, %c0_47] : memref<1x128xf32, #tpu.memory_space<vmem>>, vector<1x128xf32>
    %65 = vector.broadcast %64 : vector<1x128xf32> to vector<2x128xf32>
    %66 = arith.addf %63, %65 : vector<2x128xf32>
    %cst_48 = arith.constant 0.000000e+00 : f32
    %67 = vector.broadcast %cst_48 : f32 to vector<2x128xf32>
    %68 = arith.maximumf %66, %67 : vector<2x128xf32>
    %c0_49 = arith.constant 0 : index
    %c0_50 = arith.constant 0 : index
    %69 = vector.load %arg16[%c0_49, %c0_50] : memref<128x128xf32, #tpu.memory_space<vmem>>, vector<128x128xf32>
    %cst_51 = arith.constant dense<0.000000e+00> : vector<2x128xf32>
    %70 = tpu.matmul %68, %69, %cst_51 {dimension_numbers = #tpu.dot_dimension_numbers<[1], [0], [0], [1], [0, 0, 1, 1], [], []>} : vector<2x128xf32>, vector<128x128xf32>, vector<2x128xf32> -> vector<2x128xf32>
    %c0_52 = arith.constant 0 : index
    %c0_53 = arith.constant 0 : index
    %71 = vector.load %arg17[%c0_52, %c0_53] : memref<1x128xf32, #tpu.memory_space<vmem>>, vector<1x128xf32>
    %72 = vector.broadcast %71 : vector<1x128xf32> to vector<2x128xf32>
    %73 = arith.addf %70, %72 : vector<2x128xf32>
    %c0_54 = arith.constant 0 : index
    %c0_55 = arith.constant 0 : index
    %74 = vector.load %arg18[%c0_54, %c0_55] : memref<2x128xf32, #tpu.memory_space<vmem>>, vector<2x128xf32>
    tpu.vector_store %arg18[%c0_54, %c0_55], %73 {strides = array<i32>} : memref<2x128xf32, #tpu.memory_space<vmem>>, vector<2x128xf32>,
    return
  }
  func.func @transform_0(%arg0: i32) -> (i32, i32) {
    %c0_i32 = arith.constant 0 : i32
    %c0_i32_0 = arith.constant 0 : i32
    %c0_i32_1 = arith.constant 0 : i32
    return %c0_i32, %c0_i32_0 : i32, i32
  }
  func.func @transform_1(%arg0: i32) -> (i32, i32) {
    %c0_i32 = arith.constant 0 : i32
    %c0_i32_0 = arith.constant 0 : i32
    %c0_i32_1 = arith.constant 0 : i32
    return %c0_i32, %c0_i32_0 : i32, i32
  }
  func.func @transform_2(%arg0: i32) -> (i32, i32) {
    %c0_i32 = arith.constant 0 : i32
    %c0_i32_0 = arith.constant 0 : i32
    %c0_i32_1 = arith.constant 0 : i32
    return %c0_i32, %c0_i32_0 : i32, i32
  }
  func.func @transform_3(%arg0: i32) -> (i32, i32) {
    %c0_i32 = arith.constant 0 : i32
    %c0_i32_0 = arith.constant 0 : i32
    %c0_i32_1 = arith.constant 0 : i32
    return %c0_i32, %c0_i32_0 : i32, i32
  }
  func.func @transform_4(%arg0: i32) -> (i32, i32) {
    %c0_i32 = arith.constant 0 : i32
    %c0_i32_0 = arith.constant 0 : i32
    %c0_i32_1 = arith.constant 0 : i32
    return %c0_i32, %c0_i32_0 : i32, i32
  }
  func.func @transform_5(%arg0: i32) -> (i32, i32) {
    %c0_i32 = arith.constant 0 : i32
    %c0_i32_0 = arith.constant 0 : i32
    %c0_i32_1 = arith.constant 0 : i32
    return %c0_i32, %c0_i32_0 : i32, i32
  }
  func.func @transform_6(%arg0: i32) -> (i32, i32) {
    %c0_i32 = arith.constant 0 : i32
    %c0_i32_0 = arith.constant 0 : i32
    %c0_i32_1 = arith.constant 0 : i32
    return %c0_i32, %c0_i32_0 : i32, i32
  }
  func.func @transform_7(%arg0: i32) -> (i32, i32) {
    %c0_i32 = arith.constant 0 : i32
    %c0_i32_0 = arith.constant 0 : i32
    %c0_i32_1 = arith.constant 0 : i32
    return %c0_i32, %c0_i32_0 : i32, i32
  }
  func.func @transform_8(%arg0: i32) -> (i32, i32) {
    %c0_i32 = arith.constant 0 : i32
    %c0_i32_0 = arith.constant 0 : i32
    %c0_i32_1 = arith.constant 0 : i32
    return %c0_i32, %c0_i32_0 : i32, i32
  }
  func.func @transform_9(%arg0: i32) -> (i32, i32) {
    %c0_i32 = arith.constant 0 : i32
    %c0_i32_0 = arith.constant 0 : i32
    %c0_i32_1 = arith.constant 0 : i32
    return %c0_i32, %c0_i32_0 : i32, i32
  }
  func.func @transform_10(%arg0: i32) -> (i32, i32) {
    %c0_i32 = arith.constant 0 : i32
    %c0_i32_0 = arith.constant 0 : i32
    %c0_i32_1 = arith.constant 0 : i32
    return %c0_i32, %c0_i32_0 : i32, i32
  }
  func.func @transform_11(%arg0: i32) -> (i32, i32) {
    %c0_i32 = arith.constant 0 : i32
    %c0_i32_0 = arith.constant 0 : i32
    %c0_i32_1 = arith.constant 0 : i32
    return %c0_i32, %c0_i32_0 : i32, i32
  }
  func.func @transform_12(%arg0: i32) -> (i32, i32) {
    %c0_i32 = arith.constant 0 : i32
    %c0_i32_0 = arith.constant 0 : i32
    %c0_i32_1 = arith.constant 0 : i32
    return %c0_i32, %c0_i32_0 : i32, i32
  }
  func.func @transform_13(%arg0: i32) -> (i32, i32) {
    %c0_i32 = arith.constant 0 : i32
    %c0_i32_0 = arith.constant 0 : i32
    %c0_i32_1 = arith.constant 0 : i32
    return %c0_i32, %c0_i32_0 : i32, i32
  }
  func.func @transform_14(%arg0: i32) -> (i32, i32) {
    %c0_i32 = arith.constant 0 : i32
    %c0_i32_0 = arith.constant 0 : i32
    %c0_i32_1 = arith.constant 0 : i32
    return %c0_i32, %c0_i32_0 : i32, i32
  }
  func.func @transform_15(%arg0: i32) -> (i32, i32) {
    %c0_i32 = arith.constant 0 : i32
    %c0_i32_0 = arith.constant 0 : i32
    %c0_i32_1 = arith.constant 0 : i32
    return %c0_i32, %c0_i32_0 : i32, i32
  }
  func.func @transform_16(%arg0: i32) -> (i32, i32) {
    %c0_i32 = arith.constant 0 : i32
    %c0_i32_0 = arith.constant 0 : i32
    %c0_i32_1 = arith.constant 0 : i32
    return %c0_i32, %c0_i32_0 : i32, i32
  }
  func.func @transform_17(%arg0: i32) -> (i32, i32) {
    %c0_i32 = arith.constant 0 : i32
    %c0_i32_0 = arith.constant 0 : i32
    %c0_i32_1 = arith.constant 0 : i32
    return %c0_i32, %c0_i32_0 : i32, i32
  }
}

</mosaic_0001>

<bundles_post_ra>
// kernel: tpu_custom_call.1
= control target key start
LH: loop header
LB: loop body
LE: loop exit
PB: predicated region body
PF: predicated region fallthrough
CT: control target
= control target key end

     0   :  { %s1082_s0 = inlined_call_operand.vmem [shape: s32[32,1], index: 0, kind: input, shape index: {}]   ;;  %s1083_s1 = inlined_call_operand.vmem [shape: s32[1,32], index: 1, kind: input, shape index: {}]   ;;  %s1084_s2 = inlined_call_operand.vmem [shape: s32[1,16], index: 2, kind: input, shape index: {}]   ;;  %s1085_s3 = inlined_call_operand.hbm [shape: f32[16,128], index: 3, kind: input, shape index: {}]   ;;  %s1086_s4 = inlined_call_operand.vmem [shape: f32[32,128], index: 4, kind: input, shape index: {}]   ;;  %s1087_s5 = inlined_call_operand.hbm [shape: f32[128,128], index: 5, kind: input, shape index: {}]   ;;  %s1088_s6 = inlined_call_operand.vmem [shape: f32[1,128], index: 6, kind: input, shape index: {}]   ;;  %s1089_s7 = inlined_call_operand.hbm [shape: f32[128,128], index: 7, kind: input, shape index: {}]   ;;  %s1090_s8 = inlined_call_operand.vmem [shape: f32[1,128], index: 8, kind: input, shape index: {}]   ;;  %s1091_s9 = inlined_call_operand.hbm [shape: f32[128,128], index: 9, kind: input, shape index: {}]   ;;  %s1092_s10 = inlined_call_operand.vmem [shape: f32[1,128], index: 10, kind: input, shape index: {}]   ;;  %s1093_s11 = inlined_call_operand.hbm [shape: f32[128,128], index: 11, kind: input, shape index: {}]   ;;  %s1094_s12 = inlined_call_operand.vmem [shape: f32[1,128], index: 12, kind: input, shape index: {}]   ;;  %s1095_s13 = inlined_call_operand.hbm [shape: f32[128,128], index: 13, kind: input, shape index: {}]   ;;  %s1096_s14 = inlined_call_operand.vmem [shape: f32[1,128], index: 14, kind: input, shape index: {}]   ;;  %s1097_s15 = inlined_call_operand.hbm [shape: f32[128,128], index: 15, kind: input, shape index: {}]   ;;  %s1098_s16 = inlined_call_operand.vmem [shape: f32[1,128], index: 16, kind: input, shape index: {}]   ;;  %s1099_s17 = inlined_call_operand.hbm [shape: f32[2,128], index: 17, kind: output, shape index: {}]  }
   0x1   :  { %1101 = sst [smem:[#allocation20_spill]] %s1082_s0 }
   0x2   :  { %1102 = sst [smem:[#allocation21_spill]] %s1083_s1 }
   0x3   :  { %22 = vsyncpa [#allocation3], 0 }
   0x4   :  { %23 = vsyncpa [#allocation6], 0 }
   0x5   :  { %24 = vsyncpa [#allocation9], 0 }
   0x6   :  { %25 = vsyncpa [#allocation12], 0 }
   0x7   :  { %26 = vsyncpa [#allocation4], 0  ;;  %s52_s26 = sshll.u32 %s1087_s5, 4  ;;  %s859_s27 = smov [#allocation5]   ;;  %s53_s26 = int_to_ptr.hbm [resolvable:$true] %s52_s26 }
   0x8   :  { %s54_s28 = sshll.u32 %s859_s27, 4  ;;  %s82_s30 = sshll.u32 %s1091_s9, 4  ;;  %s55_s28 = int_to_ptr.vmem [resolvable:$true] %s54_s28  ;;  %s83_s30 = int_to_ptr.hbm [resolvable:$true] %s82_s30 }
   0x9   :  { %s860_s18 = smov 128   ;;  %s861_s19 = smov 8  }
   0xa   :  { %60 = dma.hbm_to_vmem [thread:$0]  %s53_s26, 2048, %s55_s28, [#allocation6], %s860_s18, %s860_s18, %s861_s19  }
   0xb   :  { %s862_s1 = smov [#allocation8]   ;;  %s112_s5 = sshll.u32 %s1095_s13, 4  ;;  %s113_s5 = int_to_ptr.hbm [resolvable:$true] %s112_s5 }
   0xc   :  { %s84_s20 = sshll.u32 %s862_s1, 4  ;;  %s37_s24 = sshll.u32 %s1085_s3, 4  ;;  %s85_s20 = int_to_ptr.vmem [resolvable:$true] %s84_s20  ;;  %s38_s24 = int_to_ptr.hbm [resolvable:$true] %s37_s24 }
   0xd   :  { %90 = dma.hbm_to_vmem [thread:$0]  %s83_s30, 2048, %s85_s20, [#allocation9], %s860_s18, %s860_s18, %s861_s19  }
   0xe   :  { %s863_s25 = smov [#allocation11]   ;;  %s864_s26 = smov [#allocation2]  }
   0xf   :  { %s114_s27 = sshll.u32 %s863_s25, 4  ;;  %s39_s13 = sshll.u32 %s864_s26, 4  ;;  %s115_s27 = int_to_ptr.vmem [resolvable:$true] %s114_s27  ;;  %s40_s13 = int_to_ptr.vmem [resolvable:$true] %s39_s13 }
  0x10   :  { %120 = dma.hbm_to_vmem [thread:$0]  %s113_s5, 2048, %s115_s27, [#allocation12], %s860_s18, %s860_s18, %s861_s19  }
  0x11   :  { %s67_s0 = sshll.u32 %s1089_s7, 4  ;;  %s97_s1 = sshll.u32 %s1093_s11, 4  ;;  %s68_s0 = int_to_ptr.hbm [resolvable:$true] %s67_s0  ;;  %s98_s1 = int_to_ptr.hbm [resolvable:$true] %s97_s1 }
  0x12   :  { %45 = dma.hbm_to_vmem [thread:$0]  %s38_s24, 256, %s40_s13, [#allocation3], %s860_s18, %s860_s18, %s861_s19  }
  0x13   :  { %s865_s20 = smov [#allocation7]   ;;  %s866_s22 = smov [#allocation10]  }
  0x14   :  { %s69_s21 = sshll.u32 %s865_s20, 4  ;;  %s99_s7 = sshll.u32 %s866_s22, 4  ;;  %s70_s21 = int_to_ptr.vmem [resolvable:$true] %s69_s21  ;;  %s100_s7 = int_to_ptr.vmem [resolvable:$true] %s99_s7 }
  0x15   :  { %75 = dma.hbm_to_vmem [thread:$0]  %s68_s0, 2048, %s70_s21, [#allocation6], %s860_s18, %s860_s18, %s861_s19  }
  0x16   :  { %s127_s23 = sshll.u32 %s1097_s15, 4  ;;  %s867_s11 = smov [#allocation13]   ;;  %s128_s23 = int_to_ptr.hbm [resolvable:$true] %s127_s23 }
  0x17   :  { %105 = dma.hbm_to_vmem [thread:$0]  %s98_s1, 2048, %s100_s7, [#allocation9], %s860_s18, %s860_s18, %s861_s19  }
  0x18   :  { %s129_s24 = sshll.u32 %s867_s11, 4  ;;  %s130_s24 = int_to_ptr.vmem [resolvable:$true] %s129_s24 }
  0x19   :  { %135 = dma.hbm_to_vmem [thread:$0]  %s128_s23, 2048, %s130_s24, [#allocation12], %s860_s18, %s860_s18, %s861_s19  }
  0x1a   :  { %849 = dma.done.wait [#allocation3], 256  }
  0x1b   :  { %850 = vsyncadd [#allocation3], 4294967040 }
  0x1c   :  { %851 = dma.done.wait [#allocation6], 4096  }
  0x1d   :  { %852 = vsyncadd [#allocation6], 4294963200 }
  0x1e   :  { %853 = dma.done.wait [#allocation9], 4096  }
  0x1f   :  { %854 = vsyncadd [#allocation9], 4294963200 }
  0x20   :  { %855 = dma.done.wait [#allocation12], 4096  }
  0x21   :  { %856 = vsyncadd [#allocation12], 4294963200  ;;  %v183_v0 = vld [vmem:[#allocation5 + $0x78] sm:$0xff]  ;;  %v182_v1 = vld [vmem:[#allocation5 + $0x70] sm:$0xff]  ;;  %s1103_s19 = sld [smem:[#allocation20_spill]]  ;;  %v868_v8 = vmov 0   ;;  %v274_v43 = vlaneseq }
  0x22   :  { %188 = vmatpush.msra.mxu0 %v183_v0  ;;  %v181_v2 = vld [vmem:[#allocation5 + $0x68] sm:$0xff]  ;;  %v180_v3 = vld [vmem:[#allocation5 + $0x60] sm:$0xff]  ;;  %v179_v4 = vld [vmem:[#allocation5 + $0x58] sm:$0xff]  ;;  %645 = vset.pattern.permute.xlu0 %v868_v8  ;;  %v869_v57 = vmov 0.0   ;;  %vm296_vm1 = vcmask 130048   ;;  %s1104_s15 = sld [smem:[#allocation21_spill]] }
  0x23   :  { %v178_v5 = vld [vmem:[#allocation5 + $0x50] sm:$0xff]  ;;  %v232_v9 = vld [vmem:[#allocation7 + $0x78] sm:$0xff]  ;;  %v177_v10 = vld [vmem:[#allocation5 + $0x48] sm:$0xff]  ;;  %646 = vset.pattern.permute.xlu1 %v868_v8  ;;  %v275_v45 = vand.u32 127, %v274_v43  ;;  %vm400_vm6 = vcmask 261120   ;;  %vm481_vm9 = vcmask 123904  }
  0x24   :  { %189 = vmatpush.msra.mxu0 %v182_v1  ;;  %v231_v11 = vld [vmem:[#allocation7 + $0x70] sm:$0xff]  ;;  %v176_v12 = vld [vmem:[#allocation5 + $0x40] sm:$0xff]  ;;  %237 = vmatpush.msra.mxu1 %v232_v9  ;;  %v230_v13 = vld [vmem:[#allocation7 + $0x68] sm:$0xff]  ;;  %s870_s13 = smov [#allocation14]   ;;  %s613_s3 = sshll.u32 %s1099_s17, 4  ;;  %s614_s3 = int_to_ptr.hbm [resolvable:$true] %s613_s3 }
  0x25   :  { %v175_v14 = vld [vmem:[#allocation5 + $0x38] sm:$0xff]  ;;  %v229_v16 = vld [vmem:[#allocation7 + $0x60] sm:$0xff]  ;;  %v174_v17 = vld [vmem:[#allocation5 + $0x30] sm:$0xff]  ;;  %s611_s28 = sshll.u32 %s870_s13, 4  ;;  %s612_s28 = int_to_ptr.vmem [resolvable:$true] %s611_s28 }
  0x26   :  { %190 = vmatpush.msra.mxu0 %v181_v2  ;;  %238 = vmatpush.msra.mxu1 %v231_v11  ;;  %v228_v19 = vld [vmem:[#allocation7 + $0x58] sm:$0xff]  ;;  %v173_v20 = vld [vmem:[#allocation5 + $0x28] sm:$0xff]  ;;  %v227_v21 = vld [vmem:[#allocation7 + $0x50] sm:$0xff] }
  0x27   :  { %v270_v6 = vld [vmem:[%s1103_s19] sm:$0xff]  ;;  %v272_v7 = vld [vmem:[%s1103_s19 + $0x10] sm:$0xff]  ;;  %v271_v15 = vld [vmem:[%s1103_s19 + $0x8] sm:$0xff] }
  0x28   :  { %191 = vmatpush.msra.mxu0 %v180_v3  ;;  %277 = vperm.xlu0 %645, %v270_v6   ;;  %v273_v18 = vld [vmem:[%s1103_s19 + $0x18] sm:$0xff]  ;;  %v172_v22 = vld [vmem:[#allocation5 + $0x20] sm:$0xff]  ;;  %v171_v24 = vld [vmem:[#allocation5 + $0x18] sm:$0xff] }
  0x29   :  { %283 = vperm.xlu1 %646, %v272_v7   ;;  %239 = vmatpush.msra.mxu1 %v230_v13  ;;  %v226_v23 = vld [vmem:[#allocation7 + $0x48] sm:$0xff]  ;;  %v170_v25 = vld [vmem:[#allocation5 + $0x10] sm:$0xff]  ;;  %v168_v27 = vld [vmem:[#allocation5] sm:$0xff] }
  0x2a   :  { %192 = vmatpush.msra.mxu0 %v179_v4  ;;  %v169_v26 = vld [vmem:[#allocation5 + $0x8] sm:$0xff]  ;;  %v166_v28 = vld [vmem:[#allocation2] sm:$0xff]  ;;  %v167_v29 = vld [vmem:[#allocation2 + $0x8] sm:$0xff] }
  0x2b   :  { %240 = vmatpush.msra.mxu1 %v229_v16  ;;  %v225_v30 = vld [vmem:[#allocation7 + $0x40] sm:$0xff]  ;;  %v224_v31 = vld [vmem:[#allocation7 + $0x38] sm:$0xff]  ;;  %v223_v32 = vld [vmem:[#allocation7 + $0x30] sm:$0xff] }
  0x2c   :  { %193 = vmatpush.msra.mxu0 %v178_v5  ;;  %v222_v33 = vld [vmem:[#allocation7 + $0x28] sm:$0xff]  ;;  %v221_v34 = vld [vmem:[#allocation7 + $0x20] sm:$0xff]  ;;  %v220_v35 = vld [vmem:[#allocation7 + $0x18] sm:$0xff] }
  0x2d   :  { %241 = vmatpush.msra.mxu1 %v228_v19  ;;  %v219_v36 = vld [vmem:[#allocation7 + $0x10] sm:$0xff]  ;;  %v218_v37 = vld [vmem:[#allocation7 + $0x8] sm:$0xff]  ;;  %v217_v38 = vld [vmem:[#allocation7] sm:$0xff] }
  0x2e   :  { %194 = vmatpush.msra.mxu0 %v177_v10  ;;  %v213_v39 = vld [vmem:[%s1086_s4] sm:$0xff]  ;;  %v214_v40 = vld [vmem:[%s1086_s4 + $0x8] sm:$0xff]  ;;  %v215_v42 = vld [vmem:[%s1086_s4 + $0x10] sm:$0xff] }
  0x2f   :  { %242 = vmatpush.msra.mxu1 %v227_v21  ;;  %v647_v44 = vld [vmem:[%s1088_s6] ss:$0 sm:$0xff]  ;;  %v216_v48 = vld [vmem:[%s1086_s4 + $0x18] sm:$0xff]  ;;  %v353_v49 = vld [vmem:[#allocation8 + $0x78] sm:$0xff] }
  0x30   :  { %195 = vmatpush.msra.mxu0 %v176_v12  ;;  %280 = vperm.xlu0 %645, %v271_v15   ;;  %v352_v50 = vld [vmem:[#allocation8 + $0x70] sm:$0xff]  ;;  %v351_v53 = vld [vmem:[#allocation8 + $0x68] sm:$0xff]  ;;  %v350_v55 = vld [vmem:[#allocation8 + $0x60] sm:$0xff] }
  0x31   :  { %286 = vperm.xlu1 %646, %v273_v18   ;;  %243 = vmatpush.msra.mxu1 %v226_v23  ;;  %v349_v59 = vld [vmem:[#allocation8 + $0x58] sm:$0xff]  ;;  %v348_v60 = vld [vmem:[#allocation8 + $0x50] sm:$0xff]  ;;  %v347_v62 = vld [vmem:[#allocation8 + $0x48] sm:$0xff] }
  0x32   :  { %196 = vmatpush.msra.mxu0 %v175_v14  ;;  %358 = vmatpush.msra.mxu3 %v353_v49  ;;  %v346_v63 = vld [vmem:[#allocation8 + $0x40] sm:$0xff]  ;;  %v345_v0 = vld [vmem:[#allocation8 + $0x38] sm:$0xff]  ;;  %v344_v3 = vld [vmem:[#allocation8 + $0x30] sm:$0xff] }
  0x33   :  { %244 = vmatpush.msra.mxu1 %v225_v30  ;;  %v343_v4 = vld [vmem:[#allocation8 + $0x28] sm:$0xff]  ;;  %v342_v5 = vld [vmem:[#allocation8 + $0x20] sm:$0xff]  ;;  %v341_v9 = vld [vmem:[#allocation8 + $0x18] sm:$0xff] }
  0x34   :  { %197 = vmatpush.msra.mxu0 %v174_v17  ;;  %359 = vmatpush.msra.mxu3 %v352_v50  ;;  %v340_v10 = vld [vmem:[#allocation8 + $0x10] sm:$0xff]  ;;  %v339_v11 = vld [vmem:[#allocation8 + $0x8] sm:$0xff]  ;;  %v338_v12 = vld [vmem:[#allocation8] sm:$0xff]  ;;  %v393_v50 = vshrl.u32 %v274_v43, 7 }
  0x35   :  { %245 = vmatpush.msra.mxu1 %v224_v31  ;;  %v648_v14 = vld [vmem:[%s1090_s8] ss:$0 sm:$0xff] }
  0x36   :  { %198 = vmatpush.msra.mxu0 %v173_v20  ;;  %360 = vmatpush.msra.mxu3 %v351_v53  ;;  %v650_v53 = vld [vmem:[%s1104_s15] ss:$0 sm:$0xff] }
  0x37   :  { %246 = vmatpush.msra.mxu1 %v223_v32  ;;  %vm396_vm5 = vcmp.eq.s32.totalorder %v393_v50, %v650_v53 }
  0x38   :  { %199 = vmatpush.msra.mxu0 %v172_v22  ;;  %361 = vmatpush.msra.mxu3 %v350_v55  ;;  %v439_v55 = vld [vmem:[#allocation10 + $0x38] sm:$0xff] }
  0x39   :  { %247 = vmatpush.msra.mxu1 %v222_v33 }
  0x3a   :  { %200 = vmatpush.msra.mxu0 %v171_v24  ;;  %362 = vmatpush.msra.mxu3 %v349_v59 }
  0x3b   :  { %248 = vmatpush.msra.mxu1 %v221_v34 }
  0x3c   :  { %201 = vmatpush.msra.mxu0 %v170_v25  ;;  %363 = vmatpush.msra.mxu3 %v348_v60  ;;  %v438_v60 = vld [vmem:[#allocation10 + $0x30] sm:$0xff] }
  0x3d   :  { %249 = vmatpush.msra.mxu1 %v220_v35 }
  0x3e   :  { %202 = vmatpush.msra.mxu0 %v169_v26  ;;  %364 = vmatpush.msra.mxu3 %v347_v62 }
  0x3f   :  { %250 = vmatpush.msra.mxu1 %v219_v36  ;;  %v447_v36 = vld [vmem:[#allocation10 + $0x78] sm:$0xff] }
  0x40   :  { %203 = vmatpush.msra.mxu0 %v168_v27  ;;  %365 = vmatpush.msra.mxu3 %v346_v63  ;;  %v437_v63 = vld [vmem:[#allocation10 + $0x28] sm:$0xff] }
  0x41   :  { %204 = vmatmul.f32.vlgmr.msra.gmra.mxu0 %v166_v28  ;;  %251 = vmatpush.msra.mxu1 %v218_v37  ;;  %v446_v37 = vld [vmem:[#allocation10 + $0x70] sm:$0xff] }
  0x42   :  { %366 = vmatpush.msra.mxu3 %v345_v0  ;;  %452 = vmatpush.msrb.mxu0 %v447_v36  ;;  %v580_v36 = vld [vmem:[#allocation13 + $0x78] sm:$0xff] }
  0x43   :  { %252 = vmatpush.msra.mxu1 %v217_v38  ;;  %v445_v38 = vld [vmem:[#allocation10 + $0x68] sm:$0xff] }
  0x44   :  { %253 = vmatmul.f32.vlgmr.msra.gmra.mxu1 %v213_v39  ;;  %367 = vmatpush.msra.mxu3 %v344_v3  ;;  %v394_v3 = vadd.s32 8, %v393_v50 }
  0x45   :  { %453 = vmatpush.msrb.mxu0 %v446_v37  ;;  %v579_v37 = vld [vmem:[#allocation13 + $0x70] sm:$0xff] }
  0x46   :  { %368 = vmatpush.msra.mxu3 %v343_v4  ;;  %v435_v4 = vld [vmem:[#allocation10 + $0x18] sm:$0xff]  ;;  %vm397_vm7 = vcmp.eq.s32.totalorder %v394_v3, %v650_v53  ;;  %v570_v53 = vld [vmem:[#allocation13 + $0x28] sm:$0xff] }
  0x47   :  { %454 = vmatpush.msrb.mxu0 %v445_v38  ;;  %v578_v38 = vld [vmem:[#allocation13 + $0x68] sm:$0xff] }
  0x48   :  { %369 = vmatpush.msra.mxu3 %v342_v5  ;;  %v434_v5 = vld [vmem:[#allocation10 + $0x10] sm:$0xff]  ;;  %v566_v3 = vld [vmem:[#allocation13 + $0x8] sm:$0xff] }
  0x49   :  { %207 = vmatmul.f32.gmra.mxu0 %v167_v29 }
  0x4a   :  { %370 = vmatpush.msra.mxu3 %v341_v9 }
  0x4c   :  { %256 = vmatmul.f32.gmra.mxu1 %v214_v40  ;;  %371 = vmatpush.msra.mxu3 %v340_v10  ;;  %v444_v40 = vld [vmem:[#allocation10 + $0x60] sm:$0xff] }
  0x4d   :  { %455 = vmatpush.msrb.mxu0 %v444_v40  ;;  %v576_v40 = vld [vmem:[#allocation13 + $0x58] sm:$0xff] }
  0x4e   :  { %372 = vmatpush.msra.mxu3 %v339_v11 }
  0x50   :  { %373 = vmatpush.msra.mxu3 %v338_v12 }
  0x52   :  { %585 = vmatpush.msrb.mxu3 %v580_v36 }
  0x54   :  { %259 = vmatmul.f32.gmra.mxu1 %v215_v42  ;;  %v442_v42 = vld [vmem:[#allocation10 + $0x50] sm:$0xff]  ;;  %586 = vmatpush.msrb.mxu3 %v579_v37 }
  0x56   :  { %587 = vmatpush.msrb.mxu3 %v578_v38 }
  0x5c   :  { %262 = vmatmul.f32.gmra.mxu1 %v216_v48 }
  0x9a   :  { %v278_v46 = vpop.permute.xlu0 %277 }
  0x9b   :  { %vm288_vm0 = vcmp.eq.s32.totalorder %v275_v45, %v278_v46  ;;  %v284_v2 = vpop.permute.xlu1 %283 }
  0x9c   :  { %v292_v58 = vsel %vm288_vm0, 1.0, %v869_v57  ;;  %vm290_vm3 = vcmp.eq.s32.totalorder %v275_v45, %v284_v2  ;;  %v398_v2 = vsel %vm396_vm5, 1.0, %v869_v57 }
  0x9d   :  { %v294_v6 = vsel %vm290_vm3, 1.0, %v869_v57 }
  0xa2   :  { %v281_v61 = vpop.permute.xlu0 %280 }
  0xa3   :  { %vm289_vm2 = vcmp.eq.s32.totalorder %v275_v45, %v281_v61  ;;  %v287_v7 = vpop.permute.xlu1 %286 }
  0xa4   :  { %v293_v1 = vsel %vm289_vm2, 1.0, %v869_v57  ;;  %vm291_vm4 = vcmp.eq.s32.totalorder %v275_v45, %v287_v7  ;;  %v649_v45 = vld [vmem:[%s1092_s10] ss:$0 sm:$0xff]  ;;  %v433_v7 = vld [vmem:[#allocation10 + $0x8] sm:$0xff] }
  0xa5   :  { %v295_v8 = vsel %vm291_vm4, 1.0, %v869_v57 }
  0xbe   :  { %v205_v41 = vpop.f32.mrf.mxu0 }
  0xbf   :  { %v1031_v51 = vadd.f32 %v647_v44, %v205_v41  ;;  %v443_v41 = vld [vmem:[#allocation10 + $0x58] sm:$0xff] }
  0xc0   :  { %456 = vmatpush.msrb.mxu0 %v443_v41 }
  0xc1   :  { %v211_v56 = vmax.f32 %v1031_v51, 0.0  ;;  %v254_v13 = vpop.f32.mrf.mxu1  ;;  %v537_v51 = vld [vmem:[#allocation11 + $0x68] sm:$0xff] }
  0xc2   :  { %v255_v15 = vadd.f32 %v648_v14, %v254_v13  ;;  %457 = vmatpush.msrb.mxu0 %v442_v42  ;;  %v652_v13 = vld [vmem:[%s1084_s2] ss:$0 sm:$0xff] }
  0xc3   :  { %vm479_vm8 = vcmp.eq.s32.totalorder %v393_v50, %v652_v13  ;;  %v575_v42 = vld [vmem:[#allocation13 + $0x50] sm:$0xff] }
  0xc4   :  { %v266_v17 = vmax.f32 %v255_v15, 0.0 }
  0xc6   :  { %v208_v47 = vpop.f32.mrf.mxu0 }
  0xc7   :  { %v1033_v52 = vadd.f32 %v647_v44, %v208_v47  ;;  %v441_v44 = vld [vmem:[#allocation10 + $0x48] sm:$0xff]  ;;  %v440_v47 = vld [vmem:[#allocation10 + $0x40] sm:$0xff] }
  0xc8   :  { %458 = vmatpush.msrb.mxu0 %v441_v44 }
  0xc9   :  { %v212_v54 = vmax.f32 %v1033_v52, 0.0  ;;  %v257_v16 = vpop.f32.mrf.mxu1  ;;  %v535_v52 = vld [vmem:[#allocation11 + $0x58] sm:$0xff] }
  0xca   :  { %v258_v20 = vadd.f32 %v648_v14, %v257_v16  ;;  %459 = vmatpush.msrb.mxu0 %v440_v47  ;;  %v539_v16 = vld [vmem:[#allocation11 + $0x78] sm:$0xff] }
  0xcb   :  { %323 = vmatpush.msra.mxu2 %v212_v54  ;;  %544 = vmatpush.msrb.mxu1 %v539_v16 }
  0xcc   :  { %v267_v22 = vmax.f32 %v258_v20, 0.0  ;;  %460 = vmatpush.msrb.mxu0 %v439_v55  ;;  %v569_v55 = vld [vmem:[#allocation13 + $0x20] sm:$0xff] }
  0xcd   :  { %324 = vmatpush.msra.mxu2 %v211_v56 }
  0xce   :  { %626 = vmatmul.msk.f32.vlgmr.msra.gmra.mxu2 %vm296_vm1, %v292_v58  ;;  %461 = vmatpush.msrb.mxu0 %v438_v60 }
  0xd0   :  { %462 = vmatpush.msrb.mxu0 %v437_v63 }
  0xd1   :  { %v260_v21 = vpop.f32.mrf.mxu1 }
  0xd2   :  { %v261_v25 = vadd.f32 %v648_v14, %v260_v21 }
  0xd4   :  { %v268_v26 = vmax.f32 %v261_v25, 0.0  ;;  %v532_v25 = vld [vmem:[#allocation11 + $0x40] sm:$0xff] }
  0xd6   :  { %627 = vmatmul.msk.f32.gmra.mxu2 %vm296_vm1, %v293_v1  ;;  %v436_v1 = vld [vmem:[#allocation10 + $0x20] sm:$0xff] }
  0xd7   :  { %463 = vmatpush.msrb.mxu0 %v436_v1 }
  0xd9   :  { %v263_v27 = vpop.f32.mrf.mxu1  ;;  %464 = vmatpush.msrb.mxu0 %v435_v4  ;;  %v565_v4 = vld [vmem:[#allocation13] sm:$0xff] }
  0xda   :  { %v264_v30 = vadd.f32 %v648_v14, %v263_v27  ;;  %v480_v14 = vsel %vm479_vm8, 1.0, %v869_v57  ;;  %v530_v27 = vld [vmem:[#allocation11 + $0x30] sm:$0xff] }
  0xdb   :  { %465 = vmatpush.msrb.mxu0 %v434_v5  ;;  %v482_v15 = vsel %vm481_vm9, %v480_v14, 0.0  ;;  %v653_v5 = vld [vmem:[%s1096_s14] ss:$0 sm:$0xff] }
  0xdc   :  { %v269_v31 = vmax.f32 %v264_v30, 0.0  ;;  %483 = vadd.xlane.f32.xlu2 %v482_v15  ;;  %v527_v30 = vld [vmem:[#allocation11 + $0x18] sm:$0xff] }
  0xdd   :  { %466 = vmatpush.msrb.mxu0 %v433_v7 }
  0xde   :  { %628 = vmatmul.msk.f32.gmra.mxu2 %vm296_vm1, %v294_v6  ;;  %v399_v6 = vsel %vm397_vm7, 1.0, %v869_v57 }
  0xe6   :  { %629 = vmatmul.msk.f32.gmra.mxu2 %vm296_vm1, %v295_v8  ;;  %v432_v8 = vld [vmem:[#allocation10] sm:$0xff] }
  0xe7   :  { %467 = vmatpush.msrb.mxu0 %v432_v8 }
 0x151   :  { %v326_v18 = vpop.f32.mrf.mxu2 }
 0x152   :  { %v327_v19 = vadd.f32 %v326_v18, %v266_v17  ;;  %v538_v17 = vld [vmem:[#allocation11 + $0x70] sm:$0xff] }
 0x153   :  { %545 = vmatpush.msrb.mxu1 %v538_v17  ;;  %v651_v18 = vld [vmem:[%s1094_s12] ss:$0 sm:$0xff] }
 0x154   :  { %374 = vmatmul.f32.vlgmr.msra.gmra.mxu3 %v327_v19 }
 0x155   :  { %546 = vmatpush.msrb.mxu1 %v537_v51 }
 0x159   :  { %v329_v23 = vpop.f32.mrf.mxu2 }
 0x15a   :  { %v330_v24 = vadd.f32 %v329_v23, %v267_v22  ;;  %v534_v23 = vld [vmem:[#allocation11 + $0x50] sm:$0xff] }
 0x15c   :  { %377 = vmatmul.f32.gmra.mxu3 %v330_v24  ;;  %v533_v24 = vld [vmem:[#allocation11 + $0x48] sm:$0xff] }
 0x161   :  { %v332_v28 = vpop.f32.mrf.mxu2 }
 0x162   :  { %v333_v29 = vadd.f32 %v332_v28, %v268_v26  ;;  %v531_v26 = vld [vmem:[#allocation11 + $0x38] sm:$0xff]  ;;  %v529_v28 = vld [vmem:[#allocation11 + $0x28] sm:$0xff] }
 0x164   :  { %380 = vmatmul.f32.gmra.mxu3 %v333_v29  ;;  %v528_v29 = vld [vmem:[#allocation11 + $0x20] sm:$0xff] }
 0x169   :  { %v335_v32 = vpop.f32.mrf.mxu2 }
 0x16a   :  { %v336_v33 = vadd.f32 %v335_v32, %v269_v31  ;;  %v526_v31 = vld [vmem:[#allocation11 + $0x10] sm:$0xff]  ;;  %v484_v32 = vpop.xlane.xlu2 %483 }
 0x16c   :  { %383 = vmatmul.f32.gmra.mxu3 %v336_v33  ;;  %v525_v33 = vld [vmem:[#allocation11 + $0x8] sm:$0xff] }
 0x1d7   :  { %v375_v34 = vpop.f32.mrf.mxu3 }
 0x1d8   :  { %v376_v61 = vadd.f32 %v649_v45, %v375_v34  ;;  %v485_v34 = vmax.f32 %v484_v32, 1.0 }
 0x1da   :  { %v387_v43 = vmax.f32 %v376_v61, 0.0  ;;  %655 = vrcp.f32 %v485_v34  ;;  %vm514_vm10 = vweird.f32 %v485_v34  ;;  %v518_v60 = vand.u32 2147483647, %v485_v34  ;;  %v568_v61 = vld [vmem:[#allocation13 + $0x18] sm:$0xff] }
 0x1dc   :  { %vm519_vm13 = vcmp.eq.f32.partialorder %v518_v60, 8.507059e+37 }
 0x1df   :  { %v378_v35 = vpop.f32.mrf.mxu3 }
 0x1e0   :  { %v379_v58 = vadd.f32 %v649_v45, %v378_v35  ;;  %v524_v35 = vld [vmem:[#allocation11] sm:$0xff]  ;;  %v656_v41 = vpop.eup %655 }
 0x1e1   :  { %v510_v44 = vmul.f32 %v656_v41, %v485_v34  ;;  %vm515_vm11 = vweird.f32 %v656_v41 }
 0x1e2   :  { %v388_v0 = vmax.f32 %v379_v58, 0.0  ;;  %v520_v58 = vand.u32 2147483648, %v485_v34  ;;  %vm516_vm12 = vmor %vm514_vm10, %vm515_vm11 }
 0x1e3   :  { %v511_v47 = vsub.f32 1.0, %v510_v44 }
 0x1e5   :  { %v512_v50 = vmul.f32 %v656_v41, %v511_v47 }
 0x1e7   :  { %v381_v39 = vpop.f32.mrf.mxu3 }
 0x1e8   :  { %v382_v48 = vadd.f32 %v649_v45, %v381_v39  ;;  %v577_v39 = vld [vmem:[#allocation13 + $0x60] sm:$0xff] }
 0x1e9   :  { %588 = vmatpush.msrb.mxu3 %v577_v39 }
 0x1ea   :  { %v389_v62 = vmax.f32 %v382_v48, 0.0  ;;  %v572_v48 = vld [vmem:[#allocation13 + $0x38] sm:$0xff] }
 0x1eb   :  { %589 = vmatpush.msrb.mxu3 %v576_v40 }
 0x1ed   :  { %590 = vmatpush.msrb.mxu3 %v575_v42 }
 0x1ef   :  { %v384_v46 = vpop.f32.mrf.mxu3 }
 0x1f0   :  { %v385_v49 = vadd.f32 %v649_v45, %v384_v46  ;;  %v574_v45 = vld [vmem:[#allocation13 + $0x48] sm:$0xff]  ;;  %v573_v46 = vld [vmem:[#allocation13 + $0x40] sm:$0xff] }
 0x1f1   :  { %591 = vmatpush.msrb.mxu3 %v574_v45 }
 0x1f2   :  { %v390_v59 = vmax.f32 %v385_v49, 0.0  ;;  %v571_v49 = vld [vmem:[#allocation13 + $0x30] sm:$0xff] }
 0x1f3   :  { %592 = vmatpush.msrb.mxu3 %v573_v46 }
 0x1f4   :  { %419 = vmatpush.msrb.mxu2 %v390_v59  ;;  %v513_v59 = vadd.f32 %v656_v41, %v512_v50 }
 0x1f5   :  { %593 = vmatpush.msrb.mxu3 %v572_v48 }
 0x1f6   :  { %420 = vmatpush.msrb.mxu2 %v389_v62  ;;  %v521_v62 = vor.u32 1.1754944e-38, %v520_v58  ;;  %v517_v63 = vsel %vm516_vm12, %v656_v41, %v513_v59 }
 0x1f7   :  { %594 = vmatpush.msrb.mxu3 %v571_v49 }
 0x1f8   :  { %421 = vmatpush.msrb.mxu2 %v388_v0  ;;  %v522_v1 = vsel %vm519_vm13, %v521_v62, %v517_v63 }
 0x1f9   :  { %595 = vmatpush.msrb.mxu3 %v570_v53 }
 0x1fa   :  { %422 = vmatpush.msrb.mxu2 %v387_v43 }
 0x1fb   :  { %630 = vmatmul.msk.f32.vlgmr.msrb.gmra.mxu2 %vm400_vm6, %v398_v2  ;;  %596 = vmatpush.msrb.mxu3 %v569_v55  ;;  %v567_v2 = vld [vmem:[#allocation13 + $0x10] sm:$0xff] }
 0x1fd   :  { %597 = vmatpush.msrb.mxu3 %v568_v61 }
 0x1ff   :  { %598 = vmatpush.msrb.mxu3 %v567_v2 }
 0x201   :  { %599 = vmatpush.msrb.mxu3 %v566_v3 }
 0x203   :  { %631 = vmatmul.msk.f32.gmra.mxu2 %vm400_vm6, %v399_v6  ;;  %600 = vmatpush.msrb.mxu3 %v565_v4 }
 0x27e   :  { %v424_v9 = vpop.f32.mrf.mxu2 }
 0x27f   :  { %v430_v10 = vadd.f32 %v424_v9, %v211_v56  ;;  %v536_v56 = vld [vmem:[#allocation11 + $0x60] sm:$0xff]  ;;  %v654_v9 = vld [vmem:[%s1098_s16] ss:$0 sm:$0xff] }
 0x280   :  { %547 = vmatpush.msrb.mxu1 %v536_v56 }
 0x281   :  { %468 = vmatmul.f32.vlgmr.msrb.gmra.mxu0 %v430_v10 }
 0x282   :  { %548 = vmatpush.msrb.mxu1 %v535_v52 }
 0x284   :  { %549 = vmatpush.msrb.mxu1 %v534_v23 }
 0x286   :  { %v427_v11 = vpop.f32.mrf.mxu2  ;;  %550 = vmatpush.msrb.mxu1 %v533_v24 }
 0x287   :  { %v431_v12 = vadd.f32 %v427_v11, %v212_v54 }
 0x288   :  { %551 = vmatpush.msrb.mxu1 %v532_v25 }
 0x289   :  { %471 = vmatmul.f32.gmra.mxu0 %v431_v12 }
 0x28a   :  { %552 = vmatpush.msrb.mxu1 %v531_v26 }
 0x28c   :  { %553 = vmatpush.msrb.mxu1 %v530_v27 }
 0x28e   :  { %554 = vmatpush.msrb.mxu1 %v529_v28 }
 0x290   :  { %555 = vmatpush.msrb.mxu1 %v528_v29 }
 0x292   :  { %556 = vmatpush.msrb.mxu1 %v527_v30 }
 0x294   :  { %557 = vmatpush.msrb.mxu1 %v526_v31 }
 0x296   :  { %558 = vmatpush.msrb.mxu1 %v525_v33 }
 0x298   :  { %559 = vmatpush.msrb.mxu1 %v524_v35 }
 0x2fe   :  { %v469_v54 = vpop.f32.mrf.mxu0 }
 0x2ff   :  { %v470_v57 = vadd.f32 %v651_v18, %v469_v54 }
 0x301   :  { %v475_v22 = vmax.f32 %v470_v57, 0.0 }
 0x306   :  { %v472_v19 = vpop.f32.mrf.mxu0 }
 0x307   :  { %v473_v20 = vadd.f32 %v651_v18, %v472_v19 }
 0x309   :  { %v476_v21 = vmax.f32 %v473_v20, 0.0 }
 0x30b   :  { %503 = vmatpush.msra.mxu2 %v476_v21 }
 0x30d   :  { %504 = vmatpush.msra.mxu2 %v475_v22 }
 0x30e   :  { %632 = vmatmul.msk.f32.vlgmr.msra.gmra.mxu2 %vm296_vm1, %v480_v14 }
 0x391   :  { %v506_v0 = vpop.f32.mrf.mxu2 }
 0x392   :  { %v523_v43 = vmul.f32 %v522_v1, %v506_v0 }
 0x394   :  { %560 = vmatmul.f32.vlgmr.msrb.gmra.mxu1 %v523_v43 }
 0x411   :  { %v561_v6 = vpop.f32.mrf.mxu1 }
 0x412   :  { %v562_v7 = vadd.f32 %v653_v5, %v561_v6 }
 0x414   :  { %v564_v8 = vmax.f32 %v562_v7, 0.0 }
 0x416   :  { %601 = vmatmul.f32.vlgmr.msrb.gmra.mxu3 %v564_v8 }
 0x499   :  { %v602_v10 = vpop.f32.mrf.mxu3 }
 0x49a   :  { %v603_v11 = vadd.f32 %v654_v9, %v602_v10 }
 0x49c   :  { %605 = vst [vmem:[#allocation14] sm:$0x3] %v603_v11 }
 0x49d   :  { %616 = dma.vmem_to_hbm [thread:$0]  %s612_s28, 32, %s614_s3, [#allocation4]  }
 0x49e   :  { %857 = dma.done.wait [#allocation4], 32  }
 0x49f   :  { %858 = vsyncadd [#allocation4], 4294967264 }
 0x4a0   :  { %621 = vsyncpa [#allocation3], 1 }
 0x4a1   :  { %622 = vsyncpa [#allocation6], 1 }
 0x4a2   :  { %623 = vsyncpa [#allocation9], 1 }
 0x4a3   :  { %624 = vsyncpa [#allocation12], 1 }
 0x4a4   :  { %625 = vsyncpa [#allocation4], 1 }

</bundles_post_ra>
